<compile_context>
chip_gen: v7x
topology: tpu7x:2x2x1
jax: 0.10.0
libtpu: 0.0.40
codegen_flags: <defaults>
</compile_context>

<pallas_src>
import jax
import jax.numpy as jnp
import numpy as np
from jax.experimental import pallas as pl
from jax.experimental.pallas import tpu as pltpu


def _slant_ps_kernel(d_ref, dx_ref, dy_ref, r_ref, rs_ref, o_ref):
    """One row tile: (TN, W) inputs -> fused slant + PixelShuffle output (TN, 4W)."""
    K = r_ref.shape[0]              # chunk width (128 or 256)
    W = d_ref.shape[-1]
    two_w = 2 * W
    r = r_ref[...]                  # (K, 2K) bf16: R[i, 2i] = R[i, 2i+1] = +1
    rs = rs_ref[...]                # (K, 2K) bf16: Rs[i, 2i] = -1, Rs[i, 2i+1] = +1

    def mm(x, m):
        # hi/lo bf16 split -> two single-pass bf16 MXU matmuls, fp32 accumulate.
        hi = x.astype(jnp.bfloat16)
        lo = (x - hi.astype(jnp.float32)).astype(jnp.bfloat16)
        return (jnp.dot(hi, m, preferred_element_type=jnp.float32)
                + jnp.dot(lo, m, preferred_element_type=jnp.float32))

    for k in range(W // K):                     # static, small trip count
        sl = slice(k * K, (k + 1) * K)          # 128-aligned lane slice of the tile
        d = d_ref[:, sl].astype(jnp.float32)
        gx = dx_ref[:, sl].astype(jnp.float32)
        gy = dy_ref[:, sl].astype(jnp.float32)

        e = mm(gy, rs)                          # (TN, 2K): (2*dw-1)*dy, interleaved
        row0 = mm(d - gx, r) + e                # dh = 0 output rows (i = 0)
        row1 = mm(d + gx, r) + e                # dh = 1 output rows (i = 1)

        # 128-aligned, unmasked lane-dense stores.
        o_ref[:, 2 * k * K:2 * (k + 1) * K] = row0.astype(o_ref.dtype)
        o_ref[:, two_w + 2 * k * K:two_w + 2 * (k + 1) * K] = row1.astype(o_ref.dtype)


def _row_tile(n_rows, w, itemsize):
    """Rows per grid step: ~512 KiB of one input array per step (safe within the
    scoped-VMEM default on v5e/v6e/v7x even with double-buffered inputs plus the
    (TN, 4W) fp32 output), sublane multiple of 8, and an even number of grid
    steps so the 'parallel' grid splits evenly across v7x's two TensorCores."""
    if n_rows <= 8:
        return n_rows
    by_vmem = max(8, ((512 * 1024) // (w * itemsize)) // 8 * 8)
    by_vmem = min(by_vmem, 1024)
    steps = -(-n_rows // by_vmem)
    if n_rows >= 16:
        steps = max(steps, 2)
        if steps % 2:
            steps += 1
    tn = -(-n_rows // steps)
    tn = -(-tn // 8) * 8
    return max(8, min(tn, n_rows))


def _dup_matrices(k):
    """Lane-duplication constants: exact in bf16, independent of W."""
    ids = np.arange(k)
    r = np.zeros((k, 2 * k), np.float32)
    r[ids, 2 * ids] = 1.0
    r[ids, 2 * ids + 1] = 1.0
    rs = np.zeros((k, 2 * k), np.float32)
    rs[ids, 2 * ids] = -1.0
    rs[ids, 2 * ids + 1] = 1.0
    return jnp.asarray(r, jnp.bfloat16), jnp.asarray(rs, jnp.bfloat16)


def _reference(tile_disp, tile_dx, tile_dy):
    """Pure-JAX mirror of the PyTorch module (also the fallback path)."""
    B, C, H, W = tile_disp.shape
    blocks = [tile_disp + (2 * i - 1) * tile_dx + (2 * j - 1) * tile_dy
              for i in range(2) for j in range(2)]
    disp0 = jnp.concatenate(blocks, axis=1)                 # (B, 4C, H, W)
    return (disp0.reshape(B, C, 2, 2, H, W)                 # nn.PixelShuffle(2)
                 .transpose(0, 1, 4, 2, 5, 3)
                 .reshape(B, C, 2 * H, 2 * W))


def slant_d2x_upsample_t4t2(tile_disp, tile_dx, tile_dy):
    """Exact equivalent of SlantD2xUpsampleBySlantedPlaneT4T2.forward."""
    B, C, H, W = tile_disp.shape

    # Fused Pallas path only for single-channel slant maps (the module's real
    # use) with lane-dense width.  Narrow / non-128-multiple W would force
    # masked vst stores and waste most of every vreg, and the C>1 case
    # channel-mixes across the cat/PixelShuffle pair.
    if C != 1 or W < 128 or W % 128 != 0:
        # TODO(synk): C>1 channel-mixed corner case and narrow-W stay on plain XLA.
        return _reference(tile_disp, tile_dx, tile_dy)

    dtype = tile_disp.dtype
    n = B * C * H
    d2 = tile_disp.reshape(n, W)
    gx2 = tile_dx.reshape(n, W)
    gy2 = tile_dy.reshape(n, W)

    # 256-wide chunks fill the full 256x256 MXU on v6e/v7x (half the weight
    # pushes); 128 is the native contraction width of v5e's 128x128 MXU and
    # the fallback whenever W % 256 != 0.
    k_chunk = 256 if W % 256 == 0 else 128
    r16, rs16 = _dup_matrices(k_chunk)

    tn = _row_tile(n, W, np.dtype(dtype).itemsize)
    grid = (pl.cdiv(n, tn),)

    out2 = pl.pallas_call(
        _slant_ps_kernel,
        out_shape=jax.ShapeDtypeStruct((n, 4 * W), dtype),
        grid=grid,
        in_specs=[
            pl.BlockSpec((tn, W), lambda i: (i, 0)),
            pl.BlockSpec((tn, W), lambda i: (i, 0)),
            pl.BlockSpec((tn, W), lambda i: (i, 0)),
            # Tiny constant blocks (<= 256 KiB, W-independent); the block index
            # never changes, so the pipeline only fetches them once.
            pl.BlockSpec((k_chunk, 2 * k_chunk), lambda i: (0, 0)),
            pl.BlockSpec((k_chunk, 2 * k_chunk), lambda i: (0, 0)),
        ],
        out_specs=pl.BlockSpec((tn, 4 * W), lambda i: (i, 0)),
        compiler_params=pltpu.CompilerParams(
            dimension_semantics=("parallel",),
            vmem_limit_bytes=32 * 1024 * 1024,
        ),
    )(d2, gx2, gy2, r16, rs16)

    # (N, 4W) -> (B, C, 2H, 2W) is a contiguous, zero-cost reshape (the pixel
    # shuffle already happened inside the kernel).
    return out2.reshape(B, C, 2 * H, 2 * W)


if __name__ == "__main__":
    key = jax.random.PRNGKey(0)

    def _check(B, C, H, W):
        kk = jax.random.fold_in(key, B * 1000000 + C * 100000 + H * 1000 + W)
        k1, k2, k3 = jax.random.split(kk, 3)
        disp = jax.random.normal(k1, (B, C, H, W), jnp.float32)
        dx = jax.random.normal(k2, (B, C, H, W), jnp.float32)
        dy = jax.random.normal(k3, (B, C, H, W), jnp.float32)

        out = jax.block_until_ready(jax.jit(slant_d2x_upsample_t4t2)(disp, dx, dy))
        ref = _reference(disp, dx, dy)
        assert out.shape == (B, C, 2 * H, 2 * W), out.shape
        err = float(jnp.max(jnp.abs(out - ref)))
        # The hi/lo bf16 split bounds |err| by ~1e-5 * |x| on this data; the
        # tolerance leaves a wide margin while still catching any real
        # sign / interleave / layout bug (those give O(1) errors).
        assert err < 1e-3, f"({B},{C},{H},{W}) max abs err {err}"

    _check(2, 1, 16, 128)   # fused Pallas path, K=128 chunks, 2 parallel grid steps
    _check(1, 1, 8, 256)    # fused Pallas path, K=256 chunks, single step
    _check(2, 1, 16, 16)    # narrow W -> plain-XLA fallback
    _check(2, 3, 16, 16)    # C > 1 channel-mixed corner case -> plain-XLA fallback

    print("KERNEL_OK")
</pallas_src>

<mosaic_0001>
module attributes {stable_mosaic.version = 11 : i64} {
  func.func @_slant_ps_kernel(%arg0: i32, %arg1: memref<16x128xf32, #tpu.memory_space<vmem>>, %arg2: memref<16x128xf32, #tpu.memory_space<vmem>>, %arg3: memref<16x128xf32, #tpu.memory_space<vmem>>, %arg4: memref<128x256xbf16, #tpu.memory_space<vmem>>, %arg5: memref<128x256xbf16, #tpu.memory_space<vmem>>, %arg6: memref<16x512xf32, #tpu.memory_space<vmem>>) attributes {dimension_semantics = [#tpu.dimension_semantics<parallel>], iteration_bounds = array<i64: 2>, scalar_prefetch = 0 : i64, scratch_operands = 0 : i64, tpu.core_type = #tpu.core_type<tc>, window_params = [{transform_indices = @transform_0, window_bounds = array<i64: 16, 128>}, {transform_indices = @transform_1, window_bounds = array<i64: 16, 128>}, {transform_indices = @transform_2, window_bounds = array<i64: 16, 128>}, {pipeline_mode = #tpu.pipeline_mode<synchronous>, transform_indices = @transform_3, window_bounds = array<i64: 128, 256>}, {pipeline_mode = #tpu.pipeline_mode<synchronous>, transform_indices = @transform_4, window_bounds = array<i64: 128, 256>}, {transform_indices = @transform_5, window_bounds = array<i64: 16, 512>}]} {
    %c0 = arith.constant 0 : index
    %c0_0 = arith.constant 0 : index
    %0 = vector.load %arg4[%c0, %c0_0] : memref<128x256xbf16, #tpu.memory_space<vmem>>, vector<128x256xbf16>
    %c0_1 = arith.constant 0 : index
    %c0_2 = arith.constant 0 : index
    %1 = vector.load %arg5[%c0_1, %c0_2] : memref<128x256xbf16, #tpu.memory_space<vmem>>, vector<128x256xbf16>
    %c0_3 = arith.constant 0 : index
    %c0_4 = arith.constant 0 : index
    %2 = vector.load %arg1[%c0_3, %c0_4] : memref<16x128xf32, #tpu.memory_space<vmem>>, vector<16x128xf32>
    %c0_5 = arith.constant 0 : index
    %c0_6 = arith.constant 0 : index
    %3 = vector.load %arg2[%c0_5, %c0_6] : memref<16x128xf32, #tpu.memory_space<vmem>>, vector<16x128xf32>
    %c0_7 = arith.constant 0 : index
    %c0_8 = arith.constant 0 : index
    %4 = vector.load %arg3[%c0_7, %c0_8] : memref<16x128xf32, #tpu.memory_space<vmem>>, vector<16x128xf32>
    %5 = arith.truncf %4 : vector<16x128xf32> to vector<16x128xbf16>
    %6 = arith.extf %5 : vector<16x128xbf16> to vector<16x128xf32>
    %7 = arith.subf %4, %6 : vector<16x128xf32>
    %8 = arith.truncf %7 : vector<16x128xf32> to vector<16x128xbf16>
    %cst = arith.constant dense<0.000000e+00> : vector<16x256xf32>
    %9 = tpu.matmul %5, %1, %cst {dimension_numbers = #tpu.dot_dimension_numbers<[1], [0], [0], [1], [0, 0, 1, 1], [], []>} : vector<16x128xbf16>, vector<128x256xbf16>, vector<16x256xf32> -> vector<16x256xf32>
    %cst_9 = arith.constant dense<0.000000e+00> : vector<16x256xf32>
    %10 = tpu.matmul %8, %1, %cst_9 {dimension_numbers = #tpu.dot_dimension_numbers<[1], [0], [0], [1], [0, 0, 1, 1], [], []>} : vector<16x128xbf16>, vector<128x256xbf16>, vector<16x256xf32> -> vector<16x256xf32>
    %11 = arith.addf %9, %10 : vector<16x256xf32>
    %12 = arith.subf %2, %3 : vector<16x128xf32>
    %13 = arith.truncf %12 : vector<16x128xf32> to vector<16x128xbf16>
    %14 = arith.extf %13 : vector<16x128xbf16> to vector<16x128xf32>
    %15 = arith.subf %12, %14 : vector<16x128xf32>
    %16 = arith.truncf %15 : vector<16x128xf32> to vector<16x128xbf16>
    %cst_10 = arith.constant dense<0.000000e+00> : vector<16x256xf32>
    %17 = tpu.matmul %13, %0, %cst_10 {dimension_numbers = #tpu.dot_dimension_numbers<[1], [0], [0], [1], [0, 0, 1, 1], [], []>} : vector<16x128xbf16>, vector<128x256xbf16>, vector<16x256xf32> -> vector<16x256xf32>
    %cst_11 = arith.constant dense<0.000000e+00> : vector<16x256xf32>
    %18 = tpu.matmul %16, %0, %cst_11 {dimension_numbers = #tpu.dot_dimension_numbers<[1], [0], [0], [1], [0, 0, 1, 1], [], []>} : vector<16x128xbf16>, vector<128x256xbf16>, vector<16x256xf32> -> vector<16x256xf32>
    %19 = arith.addf %17, %18 : vector<16x256xf32>
    %20 = arith.addf %19, %11 : vector<16x256xf32>
    %21 = arith.addf %2, %3 : vector<16x128xf32>
    %22 = arith.truncf %21 : vector<16x128xf32> to vector<16x128xbf16>
    %23 = arith.extf %22 : vector<16x128xbf16> to vector<16x128xf32>
    %24 = arith.subf %21, %23 : vector<16x128xf32>
    %25 = arith.truncf %24 : vector<16x128xf32> to vector<16x128xbf16>
    %cst_12 = arith.constant dense<0.000000e+00> : vector<16x256xf32>
    %26 = tpu.matmul %22, %0, %cst_12 {dimension_numbers = #tpu.dot_dimension_numbers<[1], [0], [0], [1], [0, 0, 1, 1], [], []>} : vector<16x128xbf16>, vector<128x256xbf16>, vector<16x256xf32> -> vector<16x256xf32>
    %cst_13 = arith.constant dense<0.000000e+00> : vector<16x256xf32>
    %27 = tpu.matmul %25, %0, %cst_13 {dimension_numbers = #tpu.dot_dimension_numbers<[1], [0], [0], [1], [0, 0, 1, 1], [], []>} : vector<16x128xbf16>, vector<128x256xbf16>, vector<16x256xf32> -> vector<16x256xf32>
    %28 = arith.addf %26, %27 : vector<16x256xf32>
    %29 = arith.addf %28, %11 : vector<16x256xf32>
    %c0_14 = arith.constant 0 : index
    %c0_15 = arith.constant 0 : index
    %30 = vector.load %arg6[%c0_14, %c0_15] : memref<16x512xf32, #tpu.memory_space<vmem>>, vector<16x256xf32>
    tpu.vector_store %arg6[%c0_14, %c0_15], %20 {strides = array<i32>} : memref<16x512xf32, #tpu.memory_space<vmem>>, vector<16x256xf32>,
    %c0_16 = arith.constant 0 : index
    %c256 = arith.constant 256 : index
    %31 = vector.load %arg6[%c0_16, %c256] : memref<16x512xf32, #tpu.memory_space<vmem>>, vector<16x256xf32>
    tpu.vector_store %arg6[%c0_16, %c256], %29 {strides = array<i32>} : memref<16x512xf32, #tpu.memory_space<vmem>>, vector<16x256xf32>,
    return
  }
  func.func @transform_0(%arg0: i32) -> (i32, i32) {
    %c0_i32 = arith.constant 0 : i32
    %c0_i32_0 = arith.constant 0 : i32
    return %arg0, %c0_i32 : i32, i32
  }
  func.func @transform_1(%arg0: i32) -> (i32, i32) {
    %c0_i32 = arith.constant 0 : i32
    %c0_i32_0 = arith.constant 0 : i32
    return %arg0, %c0_i32 : i32, i32
  }
  func.func @transform_2(%arg0: i32) -> (i32, i32) {
    %c0_i32 = arith.constant 0 : i32
    %c0_i32_0 = arith.constant 0 : i32
    return %arg0, %c0_i32 : i32, i32
  }
  func.func @transform_3(%arg0: i32) -> (i32, i32) {
    %c0_i32 = arith.constant 0 : i32
    %c0_i32_0 = arith.constant 0 : i32
    %c0_i32_1 = arith.constant 0 : i32
    return %c0_i32, %c0_i32_0 : i32, i32
  }
  func.func @transform_4(%arg0: i32) -> (i32, i32) {
    %c0_i32 = arith.constant 0 : i32
    %c0_i32_0 = arith.constant 0 : i32
    %c0_i32_1 = arith.constant 0 : i32
    return %c0_i32, %c0_i32_0 : i32, i32
  }
  func.func @transform_5(%arg0: i32) -> (i32, i32) {
    %c0_i32 = arith.constant 0 : i32
    %c0_i32_0 = arith.constant 0 : i32
    return %arg0, %c0_i32 : i32, i32
  }
}

</mosaic_0001>

<bundles_post_ra>
// kernel: slant_d2x_upsample_t4t2.1
= control target key start
LH: loop header
LB: loop body
LE: loop exit
PB: predicated region body
PF: predicated region fallthrough
CT: control target
= control target key end

     0   :  { %s1008_s18 = smov 0   ;;  %s1200_s0 = inlined_call_operand.vmem [shape: f32[32,128], index: 0, kind: input, shape index: {}]   ;;  %s1201_s1 = inlined_call_operand.vmem [shape: f32[32,128], index: 1, kind: input, shape index: {}]   ;;  %s1202_s2 = inlined_call_operand.vmem [shape: f32[32,128], index: 2, kind: input, shape index: {}]   ;;  %s1203_s3 = inlined_call_operand.vmem [shape: bf16[128,256], index: 3, kind: input, shape index: {}]   ;;  %s1204_s4 = inlined_call_operand.vmem [shape: bf16[128,256], index: 4, kind: input, shape index: {}]   ;;  %s1205_s5 = inlined_call_operand.vmem [shape: f32[32,512], index: 5, kind: output, shape index: {}]  }
   0x1 LB: > { %s851_s19 = sadd.s32 4294967295, %s975_s18   ;;  %p855_p0 = scmp.ge.s32.totalorder %s975_s18, 1  ;;  %s975_s18 = sphi %s1008_s18, %s15_s18  }
   0x2   : > { %p210_p1 = scmp.lt.s32.totalorder %s975_s18, 3 }
   0x4   : > { %p211_p2 = pnand %p855_p0, %p210_p1 }
   0x5   : > { %v921_v0 = vld [vmem:[%s1204_s4 + $0x4] ss:$8 sps:$4 sm:$0xff] (!%p211_p2)   ;;  %s856_s22 = sshll.u32 (!%p211_p2), %s851_s19, 1  ;;  %v923_v1 = vld [vmem:[%s1204_s4] ss:$8 sps:$4 sm:$0xff] (!%p211_p2)   ;;  %v977_v2 = vmov (!%p211_p2), 0  }
   0x6   : > { %214 = sbr.rel (%p211_p2) target bundleno = 321 (0x141), region = 40  ;;  %431 = vmatprep.mubr.bf16.mxu1 (!%p211_p2), %v977_v2  ;;  %474 = vmatprep.mubr.bf16.mxu0 (!%p211_p2), %v977_v2  ;;  %p250_p3 = scmp.lt.s32.totalorder (!%p211_p2), %s856_s22, 3  ;;  %v924_v3 = vld [vmem:[%s1204_s4 + $0x14] ss:$8 sps:$4 sm:$0xff] (!%p211_p2)   ;;  %v926_v4 = vld [vmem:[%s1204_s4 + $0x10] ss:$8 sps:$4 sm:$0xff] (!%p211_p2)  }
   0x7   : > { %399 = vmatprep.subr.bf16.mxu1 (!%p211_p2), %v921_v0  ;;  %442 = vmatprep.subr.bf16.mxu0 (!%p211_p2), %v921_v0  ;;  %v927_v5 = vld [vmem:[%s1204_s4 + $0x24] ss:$8 sps:$4 sm:$0xff] (!%p211_p2)   ;;  %v929_v6 = vld [vmem:[%s1204_s4 + $0x20] ss:$8 sps:$4 sm:$0xff] (!%p211_p2)   ;;  %v930_v7 = vld [vmem:[%s1204_s4 + $0x34] ss:$8 sps:$4 sm:$0xff] (!%p211_p2)  }
   0x8   : > { %400 = vmatpush1.bf16.msra.mxu1 (!%p211_p2), %v923_v1  ;;  %443 = vmatpush1.bf16.msra.mxu0 (!%p211_p2), %v923_v1  ;;  %v932_v8 = vld [vmem:[%s1204_s4 + $0x30] ss:$8 sps:$4 sm:$0xff] (!%p211_p2)   ;;  %v933_v9 = vld [vmem:[%s1204_s4 + $0x44] ss:$8 sps:$4 sm:$0xff] (!%p211_p2)   ;;  %v935_v10 = vld [vmem:[%s1204_s4 + $0x40] ss:$8 sps:$4 sm:$0xff] (!%p211_p2)  }
   0x9   : > { %401 = vmatprep.subr.bf16.mxu1 (!%p211_p2), %v924_v3  ;;  %444 = vmatprep.subr.bf16.mxu0 (!%p211_p2), %v924_v3  ;;  %v936_v13 = vld [vmem:[%s1204_s4 + $0x54] ss:$8 sps:$4 sm:$0xff] (!%p211_p2)   ;;  %v938_v15 = vld [vmem:[%s1204_s4 + $0x50] ss:$8 sps:$4 sm:$0xff] (!%p211_p2)   ;;  %v939_v16 = vld [vmem:[%s1204_s4 + $0x64] ss:$8 sps:$4 sm:$0xff] (!%p211_p2)  }
   0xa   : > { %v941_v19 = vld [vmem:[%s1204_s4 + $0x60] ss:$8 sps:$4 sm:$0xff] (!%p211_p2)   ;;  %v942_v20 = vld [vmem:[%s1204_s4 + $0x74] ss:$8 sps:$4 sm:$0xff] (!%p211_p2)   ;;  %v944_v23 = vld [vmem:[%s1204_s4 + $0x70] ss:$8 sps:$4 sm:$0xff] (!%p211_p2)  }
   0xb   : > { %v1078_v24 = vld [vmem:[%s1203_s3 + $0x4] ss:$8 sps:$4 sm:$0xff] (!%p211_p2)   ;;  %v1083_v26 = vld [vmem:[%s1203_s3] ss:$8 sps:$4 sm:$0xff] (!%p211_p2)   ;;  %v1090_v27 = vld [vmem:[%s1203_s3 + $0x14] ss:$8 sps:$4 sm:$0xff] (!%p211_p2)  }
   0xc   : > { %402 = vmatpush1.bf16.msra.mxu1 (!%p211_p2), %v926_v4  ;;  %445 = vmatpush1.bf16.msra.mxu0 (!%p211_p2), %v926_v4  ;;  %v1097_v28 = vld [vmem:[%s1203_s3 + $0x10] ss:$8 sps:$4 sm:$0xff] (!%p211_p2)   ;;  %v1104_v29 = vld [vmem:[%s1203_s3 + $0x24] ss:$8 sps:$4 sm:$0xff] (!%p211_p2)   ;;  %v1117_v30 = vld [vmem:[%s1203_s3 + $0x20] ss:$8 sps:$4 sm:$0xff] (!%p211_p2)  }
   0xd   : > { %s1207_s22 = smov (!%p250_p3, %s856_s22), 3  ;;  %403 = vmatprep.subr.bf16.mxu1 %v927_v5  ;;  %446 = vmatprep.subr.bf16.mxu0 %v927_v5  ;;  %v1128_v31 = vld [vmem:[%s1203_s3 + $0x34] ss:$8 sps:$4 sm:$0xff]   ;;  %v1133_v32 = vld [vmem:[%s1203_s3 + $0x30] ss:$8 sps:$4 sm:$0xff]  }
   0xe   : > { %s1042_s10 = sshll.u32 %s1207_s22, 3  ;;  %v957_v37 = vld [vmem:[%s1203_s3 + $0x44] ss:$8 sps:$4 sm:$0xff]   ;;  %v959_v42 = vld [vmem:[%s1203_s3 + $0x40] ss:$8 sps:$4 sm:$0xff]   ;;  %s899_s27 = sshll.u32 %s1207_s22, 5 }
   0xf   : > { %s265_s15 = scalar_lea.vmem %s1202_s2, %s1042_s10  ;;  %s253_s24 = scalar_lea.vmem %s1200_s0, %s1042_s10  ;;  %v960_v43 = vld [vmem:[%s1203_s3 + $0x54] ss:$8 sps:$4 sm:$0xff]   ;;  %v962_v46 = vld [vmem:[%s1203_s3 + $0x50] ss:$8 sps:$4 sm:$0xff]   ;;  %v963_v47 = vld [vmem:[%s1203_s3 + $0x64] ss:$8 sps:$4 sm:$0xff]  }
  0x10   : > { %404 = vmatpush1.bf16.msra.mxu1 %v929_v6  ;;  %447 = vmatpush1.bf16.msra.mxu0 %v929_v6  ;;  %v311_v11 = vld [vmem:[%s265_s15] sm:$0xff]  ;;  %v312_v12 = vld [vmem:[%s265_s15 + $0x8] sm:$0xff]  ;;  %s259_s29 = scalar_lea.vmem %s1201_s1, %s1042_s10  ;;  %v966_v53 = vld [vmem:[%s1203_s3 + $0x74] ss:$8 sps:$4 sm:$0xff]   ;;  %s272_s30 = scalar_lea.vmem %s1205_s5, %s899_s27 }
  0x11   : > { %405 = vmatprep.subr.bf16.mxu1 %v930_v7  ;;  %448 = vmatprep.subr.bf16.mxu0 %v930_v7  ;;  %v313_v14 = vpack.c.bf16 %v312_v12, %v311_v11  ;;  %v307_v33 = vld [vmem:[%s253_s24] sm:$0xff]  ;;  %v308_v34 = vld [vmem:[%s253_s24 + $0x8] sm:$0xff]  ;;  %v968_v58 = vld [vmem:[%s1203_s3 + $0x70] ss:$8 sps:$4 sm:$0xff]  }
  0x12   : > { %v309_v35 = vld [vmem:[%s259_s29] sm:$0xff]  ;;  %v310_v36 = vld [vmem:[%s259_s29 + $0x8] sm:$0xff] }
  0x13   : > { %v314_v17 = vunpack.c.l.bf16 %v313_v14  ;;  %v315_v18 = vunpack.c.h.bf16 %v313_v14  ;;  %v485_v38 = vsub.f32 %v307_v33, %v309_v35  ;;  %v486_v39 = vsub.f32 %v308_v34, %v310_v36  ;;  %v965_v52 = vld [vmem:[%s1203_s3 + $0x60] ss:$8 sps:$4 sm:$0xff]  }
  0x14   : > { %406 = vmatpush1.bf16.msra.mxu1 %v932_v8  ;;  %449 = vmatpush1.bf16.msra.mxu0 %v932_v8  ;;  %v663_v40 = vadd.f32 %v309_v35, %v307_v33  ;;  %v664_v41 = vadd.f32 %v310_v36, %v308_v34 }
  0x15   : > { %407 = vmatprep.subr.bf16.mxu1 %v933_v9  ;;  %450 = vmatprep.subr.bf16.mxu0 %v933_v9  ;;  %v316_v21 = vsub.f32 %v311_v11, %v314_v17  ;;  %v317_v22 = vsub.f32 %v312_v12, %v315_v18  ;;  %v1150_v44 = vpack.c.bf16 %v486_v39, %v485_v38 }
  0x16   : > { %v1152_v45 = vpack.c.bf16 %v664_v41, %v663_v40 }
  0x17   : > { %v318_v25 = vpack.c.bf16 %v317_v22, %v316_v21  ;;  %v488_v48 = vunpack.c.l.bf16 %v1150_v44  ;;  %v489_v49 = vunpack.c.h.bf16 %v1150_v44 }
  0x18   : > { %408 = vmatpush1.bf16.msra.mxu1 %v935_v10  ;;  %451 = vmatpush1.bf16.msra.mxu0 %v935_v10  ;;  %v666_v50 = vunpack.c.l.bf16 %v1152_v45  ;;  %v667_v51 = vunpack.c.h.bf16 %v1152_v45 }
  0x19   : > { %409 = vmatprep.subr.bf16.mxu1 %v936_v13  ;;  %452 = vmatprep.subr.bf16.mxu0 %v936_v13  ;;  %v490_v54 = vsub.f32 %v485_v38, %v488_v48  ;;  %v491_v55 = vsub.f32 %v486_v39, %v489_v49 }
  0x1a   : > { %v668_v56 = vsub.f32 %v663_v40, %v666_v50  ;;  %v669_v57 = vsub.f32 %v664_v41, %v667_v51 }
  0x1b   : > { %v492_v59 = vpack.c.bf16 %v491_v55, %v490_v54 }
  0x1c   : > { %410 = vmatpush1.bf16.msra.mxu1 %v938_v15  ;;  %453 = vmatpush1.bf16.msra.mxu0 %v938_v15  ;;  %v670_v60 = vpack.c.bf16 %v669_v57, %v668_v56 }
  0x1d   : > { %411 = vmatprep.subr.bf16.mxu1 %v939_v16  ;;  %454 = vmatprep.subr.bf16.mxu0 %v939_v16 }
  0x20   : > { %412 = vmatpush1.bf16.msra.mxu1 %v941_v19  ;;  %455 = vmatpush1.bf16.msra.mxu0 %v941_v19 }
  0x21   : > { %413 = vmatprep.subr.bf16.mxu1 %v942_v20  ;;  %456 = vmatprep.subr.bf16.mxu0 %v942_v20 }
  0x24   : > { %414 = vmatpush1.bf16.msra.mxu1 %v944_v23  ;;  %457 = vmatpush1.bf16.msra.mxu0 %v944_v23 }
  0x25   : > { %573 = vmatprep.subr.bf16.mxu1 %v1078_v24  ;;  %671 = vmatprep.subr.bf16.mxu0 %v1078_v24 }
  0x27   : > { %432 = vmatmul.mubr.bf16.vlgmr.msra.gmra.mrb[0].mxu1 %v318_v25  ;;  %475 = vmatmul.mubr.bf16.vlgmr.msra.gmra.mrb[0].mxu0 %v313_v14 }
  0x28   : > { %574 = vmatpush1.bf16.msra.mxu1 %v1083_v26  ;;  %672 = vmatpush1.bf16.msra.mxu0 %v1083_v26 }
  0x29   : > { %575 = vmatprep.subr.bf16.mxu1 %v1090_v27  ;;  %673 = vmatprep.subr.bf16.mxu0 %v1090_v27 }
  0x2a   : > { %605 = vmatprep.mubr.bf16.mxu1 %v977_v2  ;;  %703 = vmatprep.mubr.bf16.mxu0 %v977_v2 }
  0x2c   : > { %576 = vmatpush1.bf16.msra.mxu1 %v1097_v28  ;;  %674 = vmatpush1.bf16.msra.mxu0 %v1097_v28 }
  0x2d   : > { %577 = vmatprep.subr.bf16.mxu1 %v1104_v29  ;;  %675 = vmatprep.subr.bf16.mxu0 %v1104_v29 }
  0x30   : > { %578 = vmatpush1.bf16.msra.mxu1 %v1117_v30  ;;  %676 = vmatpush1.bf16.msra.mxu0 %v1117_v30 }
  0x31   : > { %579 = vmatprep.subr.bf16.mxu1 %v1128_v31  ;;  %677 = vmatprep.subr.bf16.mxu0 %v1128_v31 }
  0x34   : > { %580 = vmatpush1.bf16.msra.mxu1 %v1133_v32  ;;  %678 = vmatpush1.bf16.msra.mxu0 %v1133_v32 }
  0x35   : > { %581 = vmatprep.subr.bf16.mxu1 %v957_v37  ;;  %679 = vmatprep.subr.bf16.mxu0 %v957_v37 }
  0x38   : > { %582 = vmatpush1.bf16.msra.mxu1 %v959_v42  ;;  %680 = vmatpush1.bf16.msra.mxu0 %v959_v42 }
  0x39   : > { %583 = vmatprep.subr.bf16.mxu1 %v960_v43  ;;  %681 = vmatprep.subr.bf16.mxu0 %v960_v43 }
  0x3c   : > { %584 = vmatpush1.bf16.msra.mxu1 %v962_v46  ;;  %682 = vmatpush1.bf16.msra.mxu0 %v962_v46 }
  0x3d   : > { %585 = vmatprep.subr.bf16.mxu1 %v963_v47  ;;  %683 = vmatprep.subr.bf16.mxu0 %v963_v47 }
  0x40   : > { %586 = vmatpush1.bf16.msra.mxu1 %v965_v52  ;;  %684 = vmatpush1.bf16.msra.mxu0 %v965_v52 }
  0x41   : > { %587 = vmatprep.subr.bf16.mxu1 %v966_v53  ;;  %685 = vmatprep.subr.bf16.mxu0 %v966_v53 }
  0x44   : > { %588 = vmatpush1.bf16.msra.mxu1 %v968_v58  ;;  %686 = vmatpush1.bf16.msra.mxu0 %v968_v58 }
  0x45   : > { %616 = vmatprep.subr.bf16.mxu1 %v1078_v24  ;;  %714 = vmatprep.subr.bf16.mxu0 %v1078_v24 }
  0x47   : > { %606 = vmatmul.mubr.bf16.vlgmr.msra.gmra.mrb[4].mxu1 %v492_v59  ;;  %704 = vmatmul.mubr.bf16.vlgmr.msra.gmra.mrb[4].mxu0 %v670_v60 }
  0x48   : > { %617 = vmatpush1.bf16.msra.mxu1 %v1083_v26  ;;  %715 = vmatpush1.bf16.msra.mxu0 %v1083_v26 }
  0x49   : > { %618 = vmatprep.subr.bf16.mxu1 %v1090_v27  ;;  %716 = vmatprep.subr.bf16.mxu0 %v1090_v27 }
  0x4a   : > { %648 = vmatprep.mubr.bf16.mxu1 %v977_v2  ;;  %746 = vmatprep.mubr.bf16.mxu0 %v977_v2 }
  0x4c   : > { %619 = vmatpush1.bf16.msra.mxu1 %v1097_v28  ;;  %717 = vmatpush1.bf16.msra.mxu0 %v1097_v28 }
  0x4d   : > { %620 = vmatprep.subr.bf16.mxu1 %v1104_v29  ;;  %718 = vmatprep.subr.bf16.mxu0 %v1104_v29 }
  0x50   : > { %621 = vmatpush1.bf16.msra.mxu1 %v1117_v30  ;;  %719 = vmatpush1.bf16.msra.mxu0 %v1117_v30 }
  0x51   : > { %622 = vmatprep.subr.bf16.mxu1 %v1128_v31  ;;  %720 = vmatprep.subr.bf16.mxu0 %v1128_v31 }
  0x54   : > { %623 = vmatpush1.bf16.msra.mxu1 %v1133_v32  ;;  %721 = vmatpush1.bf16.msra.mxu0 %v1133_v32 }
  0x55   : > { %624 = vmatprep.subr.bf16.mxu1 %v957_v37  ;;  %722 = vmatprep.subr.bf16.mxu0 %v957_v37 }
  0x58   : > { %625 = vmatpush1.bf16.msra.mxu1 %v959_v42  ;;  %723 = vmatpush1.bf16.msra.mxu0 %v959_v42 }
  0x59   : > { %626 = vmatprep.subr.bf16.mxu1 %v960_v43  ;;  %724 = vmatprep.subr.bf16.mxu0 %v960_v43 }
  0x5c   : > { %627 = vmatpush1.bf16.msra.mxu1 %v962_v46  ;;  %725 = vmatpush1.bf16.msra.mxu0 %v962_v46 }
  0x5d   : > { %628 = vmatprep.subr.bf16.mxu1 %v963_v47  ;;  %726 = vmatprep.subr.bf16.mxu0 %v963_v47 }
  0x60   : > { %629 = vmatpush1.bf16.msra.mxu1 %v965_v52  ;;  %727 = vmatpush1.bf16.msra.mxu0 %v965_v52 }
  0x61   : > { %630 = vmatprep.subr.bf16.mxu1 %v966_v53  ;;  %728 = vmatprep.subr.bf16.mxu0 %v966_v53 }
  0x64   : > { %631 = vmatpush1.bf16.msra.mxu1 %v968_v58  ;;  %729 = vmatpush1.bf16.msra.mxu0 %v968_v58 }
  0x67   : > { %649 = vmatmul.mubr.bf16.vlgmr.msra.gmra.mrb[4].mxu1 %v1150_v44  ;;  %747 = vmatmul.mubr.bf16.vlgmr.msra.gmra.mrb[4].mxu0 %v1152_v45 }
  0xfa   : > { %v433_v61 = vpop.f32.mrb[0].mxu1  ;;  %v476_v62 = vpop.f32.mrb[0].mxu0 }
  0xfb   : > { %v477_v63 = vadd.f32 %v476_v62, %v433_v61  ;;  %v435_v0 = vpop.f32.mrb[1].mxu1  ;;  %v478_v1 = vpop.f32.mrb[1].mxu0 }
  0xfc   : > { %v479_v2 = vadd.f32 %v478_v1, %v435_v0  ;;  %v437_v3 = vpop.f32.mrb[2].mxu1  ;;  %v480_v4 = vpop.f32.mrb[2].mxu0 }
  0xfd   : > { %v481_v5 = vadd.f32 %v480_v4, %v437_v3  ;;  %v439_v6 = vpop.f32.mrb[3].mxu1  ;;  %v482_v7 = vpop.f32.mrb[3].mxu0 }
  0xfe   : > { %v483_v8 = vadd.f32 %v482_v7, %v439_v6 }
 0x13a   : > { %v650_v9 = vpop.f32.mrb[4].mxu1  ;;  %v748_v10 = vpop.f32.mrb[4].mxu0 }
 0x13b   : > { %v659_v11 = vadd.f32 %v650_v9, %v477_v63  ;;  %v757_v12 = vadd.f32 %v748_v10, %v477_v63  ;;  %v652_v13 = vpop.f32.mrb[5].mxu1  ;;  %v750_v14 = vpop.f32.mrb[5].mxu0 }
 0x13c   : > { %v660_v15 = vadd.f32 %v652_v13, %v479_v2  ;;  %v758_v16 = vadd.f32 %v750_v14, %v479_v2  ;;  %v654_v17 = vpop.f32.mrb[6].mxu1  ;;  %v752_v18 = vpop.f32.mrb[6].mxu0 }
 0x13d   : > { %761 = vst [vmem:[%s272_s30] sm:$0xff] %v659_v11  ;;  %765 = vst [vmem:[%s272_s30 + $0x10] sm:$0xff] %v757_v12  ;;  %v661_v19 = vadd.f32 %v654_v17, %v481_v5  ;;  %v759_v20 = vadd.f32 %v752_v18, %v481_v5  ;;  %v656_v21 = vpop.f32.mrb[7].mxu1  ;;  %v754_v22 = vpop.f32.mrb[7].mxu0 }
 0x13e   : > { %762 = vst [vmem:[%s272_s30 + $0x8] sm:$0xff] %v660_v15  ;;  %766 = vst [vmem:[%s272_s30 + $0x18] sm:$0xff] %v758_v16  ;;  %v662_v23 = vadd.f32 %v656_v21, %v483_v8  ;;  %v760_v24 = vadd.f32 %v754_v22, %v483_v8 }
 0x13f   : > { %763 = vst [vmem:[%s272_s30 + $0x20] sm:$0xff] %v661_v19  ;;  %767 = vst [vmem:[%s272_s30 + $0x30] sm:$0xff] %v759_v20 }
 0x140   : > { %764 = vst [vmem:[%s272_s30 + $0x28] sm:$0xff] %v662_v23  ;;  %768 = vst [vmem:[%s272_s30 + $0x38] sm:$0xff] %v760_v24 }
 0x141 PF: > { %s15_s18 = sadd.s32 1, %s975_s18  }
 0x142   : > { %p12_p4 = scmp.ge.s32.totalorder %s15_s18, 4  }
 0x144   :  { %14 = sbr.rel (!%p12_p4) target bundleno = 1 (0x1), region = 76 }

</bundles_post_ra>
